<compile_context>
chip_gen: v7x
topology: tpu7x:2x2x1
jax: 0.10.0
libtpu: 0.0.40
codegen_flags: <defaults>
</compile_context>

<pallas_src>
import jax
import jax.numpy as jnp
from jax.experimental import pallas as pl
from jax.experimental.pallas import tpu as pltpu

_LANE = 128
_SUB = 8
_MAX_TILE_ROWS = 2048   # (2048, 128) f32 = 1 MiB per input tile


def _round_up(x, m):
    return ((x + m - 1) // m) * m


def _l2_reduce_kernel(n_ref, score_ref, label_ref, out_ref, acc_ref):
    c = pl.program_id(0)
    i = pl.program_id(1)
    steps = pl.num_programs(1)

    @pl.when(i == 0)
    def _():
        acc_ref[...] = jnp.zeros_like(acc_ref)

    tile_rows = score_ref.shape[0]
    block_elems = tile_rows * _LANE
    # Global element offset of this (unclamped) block; the index_map clamps
    # the DMA source, the mask below makes clamped / ragged blocks contribute
    # exactly zero.
    start = (c * steps + i) * block_elems
    n = n_ref[0]

    x = score_ref[...].astype(jnp.float32)
    s = 0.5 * (jnp.tanh(0.5 * x) + 1.0)            # sigmoid, single EUP op
    d = s - label_ref[...].astype(jnp.float32)
    sq = d * d

    def _accumulate(vals):
        # Fold tile_rows -> 8 sublanes: pure VPU vreg adds, no XLU, and the
        # accumulator RMW touches only one vreg per step.
        acc_ref[...] += jnp.sum(
            vals.reshape(tile_rows // _SUB, _SUB, _LANE), axis=0)

    @pl.when(start + block_elems <= n)
    def _():                                        # interior block: no mask
        _accumulate(sq)

    @pl.when(start + block_elems > n)
    def _():                                        # ragged / clamped block
        row = jax.lax.broadcasted_iota(jnp.int32, (tile_rows, _LANE), 0)
        lane = jax.lax.broadcasted_iota(jnp.int32, (tile_rows, _LANE), 1)
        valid = (row * _LANE + lane) < (n - start)
        _accumulate(jnp.where(valid, sq, 0.0))

    @pl.when(i == steps - 1)
    def _():
        # Dump the vreg accumulator; the cross-lane sum happens in the wrapper.
        out_ref[...] = acc_ref[...].reshape(out_ref.shape)


def _l2_none_kernel(score_ref, label_ref, out_ref):
    x = score_ref[...].astype(jnp.float32)
    s = 0.5 * (jnp.tanh(0.5 * x) + 1.0)
    d = s - label_ref[...].astype(jnp.float32)
    out_ref[...] = (d * d).astype(out_ref.dtype)


class L2Loss:
    """JAX/Pallas equivalent of the PyTorch L2Loss module."""

    def __init__(self, reduction='mean', max_tile_rows=_MAX_TILE_ROWS,
                 core_split=1):
        self.reduction = reduction
        self.max_tile_rows = max_tile_rows
        # core_split=2 shards the reduction across the two TensorCores of a
        # v7x chip; on single-TC v5e/v6e keep the default 1 (a larger split
        # stays correct, it just serializes).
        self.core_split = max(1, core_split)

    def __call__(self, score, label):
        # TODO(synk): PyTorch would broadcast a 1-D score against
        # label.view(-1, 1) into an (N, N) loss matrix; we implement the
        # common elementwise case where score is (N,) or (N, 1).
        score_f = score.reshape(-1)
        label_f = label.reshape(-1)
        if not jnp.issubdtype(label_f.dtype, jnp.floating):
            # Binary/integer labels: bf16 is exact for 0/1 and halves the
            # label HBM traffic; the kernel upcasts to f32 in VMEM.
            label_f = label_f.astype(jnp.bfloat16)
        n = score_f.shape[0]

        if n == 0:
            if self.reduction == 'sum':
                return jnp.float32(0.0)
            if self.reduction == 'mean':
                return jnp.float32(jnp.nan)
            return jnp.zeros((0, 1), jnp.float32)

        padded_n = _round_up(n, _LANE)
        rows = padded_n // _LANE
        if padded_n != n:
            # Only when n is not lane-aligned: minimal pad so the (rows, 128)
            # view exists; the padded tail is masked / sliced off.
            score_f = jnp.pad(score_f, (0, padded_n - n))
            label_f = jnp.pad(label_f, (0, padded_n - n))
        score2 = score_f.reshape(rows, _LANE)
        label2 = label_f.reshape(rows, _LANE)

        tile_rows = min(self.max_tile_rows, _round_up(rows, _SUB))
        total_blocks = pl.cdiv(rows, tile_rows)

        if self.reduction in ('mean', 'sum'):
            core_split = min(self.core_split, total_blocks)
            steps = pl.cdiv(total_blocks, core_split)
            last_block = total_blocks - 1

            def in_map(c, i, n_ref):
                # Clamp the DMA source for the uneven remainder; the kernel
                # masks by element index so re-read blocks contribute zero.
                return (jnp.minimum(c * steps + i, last_block), 0)

            out = pl.pallas_call(
                _l2_reduce_kernel,
                out_shape=jax.ShapeDtypeStruct(
                    (core_split, _SUB, _LANE), jnp.float32),
                grid_spec=pltpu.PrefetchScalarGridSpec(
                    num_scalar_prefetch=1,
                    grid=(core_split, steps),
                    in_specs=[pl.BlockSpec((tile_rows, _LANE), in_map),
                              pl.BlockSpec((tile_rows, _LANE), in_map)],
                    out_specs=pl.BlockSpec((1, _SUB, _LANE),
                                           lambda c, i, n_ref: (c, 0, 0)),
                    scratch_shapes=[pltpu.VMEM((_SUB, _LANE), jnp.float32)],
                ),
                compiler_params=pltpu.CompilerParams(
                    dimension_semantics=("parallel", "arbitrary")),
            )(jnp.array([n], dtype=jnp.int32), score2, label2)
            total = out.sum()   # tiny (core_split*8*128) reduce in the wrapper
            if self.reduction == 'mean':
                return total / jnp.float32(n)
            return total

        # reduction == 'none'
        out_dtype = jnp.promote_types(score2.dtype, label2.dtype)
        if not jnp.issubdtype(out_dtype, jnp.floating):
            out_dtype = jnp.float32

        row_spec = pl.BlockSpec((tile_rows, _LANE), lambda i: (i, 0))
        out = pl.pallas_call(
            _l2_none_kernel,
            out_shape=jax.ShapeDtypeStruct((rows, _LANE), out_dtype),
            grid=(total_blocks,),
            in_specs=[row_spec, row_spec],
            out_specs=row_spec,
            compiler_params=pltpu.CompilerParams(
                dimension_semantics=("parallel",)),
        )(score2, label2)
        flat = out.reshape(-1)
        if padded_n != n:
            flat = flat[:n]     # only copies in the non-lane-aligned case
        return flat.reshape(-1, 1)


def _reference(score, label, reduction):
    label = label.reshape(-1, 1).astype(jnp.float32)
    s = jax.nn.sigmoid(score.astype(jnp.float32)).reshape(-1, 1)
    l2 = (s - label) ** 2
    if reduction == 'mean':
        return l2.mean()
    if reduction == 'sum':
        return l2.sum()
    return l2


if __name__ == "__main__":
    key = jax.random.PRNGKey(0)
    k1, k2 = jax.random.split(key)

    ok = True
    # Small shapes typical of the module: score (N, 1), label (N,).
    # n=256 is lane-aligned (zero-copy path); n=300 exercises the ragged tail.
    for n in (256, 300):
        score = jax.random.normal(k1, (n, 1), dtype=jnp.float32)
        label = (jax.random.uniform(k2, (n,)) > 0.5).astype(jnp.float32)
        for red in ('mean', 'sum', 'none'):
            out = jax.block_until_ready(L2Loss(reduction=red)(score, label))
            ref = _reference(score, label, red)
            if not jnp.allclose(out, ref, atol=1e-5, rtol=1e-5):
                ok = False
                print(f"MISMATCH n={n} reduction={red}")

        # Integer labels exercise the bf16-label fast path.
        label_i = (jax.random.uniform(k2, (n,)) > 0.5).astype(jnp.int32)
        out = jax.block_until_ready(L2Loss(reduction='mean')(score, label_i))
        ref = _reference(score, label_i.astype(jnp.float32), 'mean')
        if not jnp.allclose(out, ref, atol=1e-5, rtol=1e-5):
            ok = False
            print(f"MISMATCH int-label n={n}")

    # Multi-step accumulation + 2-way core split (serialises on 1-TC chips).
    n = 8192
    score = jax.random.normal(k1, (n, 1), dtype=jnp.float32)
    label = (jax.random.uniform(k2, (n,)) > 0.5).astype(jnp.float32)
    for red in ('mean', 'sum'):
        out = jax.block_until_ready(
            L2Loss(reduction=red, max_tile_rows=8, core_split=2)(score, label))
        ref = _reference(score, label, red)
        if not jnp.allclose(out, ref, atol=1e-4, rtol=1e-5):
            ok = False
            print(f"MISMATCH multi-step reduction={red}")

    if ok:
        print("KERNEL_OK")
</pallas_src>

<mosaic_0001>
module attributes {stable_mosaic.version = 11 : i64} {
  func.func @_l2_reduce_kernel(%arg0: i32, %arg1: i32, %arg2: memref<1xi32, #tpu.memory_space<smem>>, %arg3: memref<8x128xf32, #tpu.memory_space<vmem>>, %arg4: memref<8x128xf32, #tpu.memory_space<vmem>>, %arg5: memref<1x8x128xf32, #tpu.memory_space<vmem>>, %arg6: memref<8x128xf32, #tpu.memory_space<vmem>>) attributes {dimension_semantics = [#tpu.dimension_semantics<parallel>, #tpu.dimension_semantics<arbitrary>], iteration_bounds = array<i64: 1, 1>, scalar_prefetch = 1 : i64, scratch_operands = 1 : i64, tpu.core_type = #tpu.core_type<tc>, window_params = [{transform_indices = @transform_0, window_bounds = array<i64: 8, 128>}, {transform_indices = @transform_1, window_bounds = array<i64: 8, 128>}, {transform_indices = @transform_2, window_bounds = array<i64: 1, 8, 128>}]} {
    %c0_i32 = arith.constant 0 : i32
    %0 = arith.cmpi eq, %arg1, %c0_i32 : i32
    %1 = arith.extui %0 : i1 to i32
    %c0_i32_0 = arith.constant 0 : i32
    %2 = arith.cmpi ne, %1, %c0_i32_0 : i32
    scf.if %2 {
      %cst_13 = arith.constant 0.000000e+00 : f32
      %29 = vector.broadcast %cst_13 : f32 to vector<8x128xf32>
      %c0_14 = arith.constant 0 : index
      %c0_15 = arith.constant 0 : index
      %30 = vector.load %arg6[%c0_14, %c0_15] : memref<8x128xf32, #tpu.memory_space<vmem>>, vector<8x128xf32>
      tpu.vector_store %arg6[%c0_14, %c0_15], %29 {strides = array<i32>} : memref<8x128xf32, #tpu.memory_space<vmem>>, vector<8x128xf32>,
    } else {
    }
    %c1_i32 = arith.constant 1 : i32
    %3 = arith.muli %arg0, %c1_i32 : i32
    %4 = arith.addi %3, %arg1 : i32
    %c1024_i32 = arith.constant 1024 : i32
    %5 = arith.muli %4, %c1024_i32 : i32
    %c0 = arith.constant 0 : index
    %6 = memref.load %arg2[%c0] : memref<1xi32, #tpu.memory_space<smem>>
    %c0_1 = arith.constant 0 : index
    %c0_2 = arith.constant 0 : index
    %7 = vector.load %arg3[%c0_1, %c0_2] : memref<8x128xf32, #tpu.memory_space<vmem>>, vector<8x128xf32>
    %cst = arith.constant 5.000000e-01 : f32
    %8 = vector.broadcast %cst : f32 to vector<8x128xf32>
    %9 = arith.mulf %8, %7 : vector<8x128xf32>
    %10 = math.tanh %9 : vector<8x128xf32>
    %cst_3 = arith.constant 1.000000e+00 : f32
    %11 = vector.broadcast %cst_3 : f32 to vector<8x128xf32>
    %12 = arith.addf %10, %11 : vector<8x128xf32>
    %cst_4 = arith.constant 5.000000e-01 : f32
    %13 = vector.broadcast %cst_4 : f32 to vector<8x128xf32>
    %14 = arith.mulf %13, %12 : vector<8x128xf32>
    %c0_5 = arith.constant 0 : index
    %c0_6 = arith.constant 0 : index
    %15 = vector.load %arg4[%c0_5, %c0_6] : memref<8x128xf32, #tpu.memory_space<vmem>>, vector<8x128xf32>
    %16 = arith.subf %14, %15 : vector<8x128xf32>
    %17 = arith.mulf %16, %16 : vector<8x128xf32>
    %c1024_i32_7 = arith.constant 1024 : i32
    %18 = arith.addi %5, %c1024_i32_7 : i32
    %19 = arith.cmpi sle, %18, %6 : i32
    %20 = arith.extui %19 : i1 to i32
    %c0_i32_8 = arith.constant 0 : i32
    %21 = arith.cmpi ne, %20, %c0_i32_8 : i32
    scf.if %21 {
      %c0_13 = arith.constant 0 : index
      %c0_14 = arith.constant 0 : index
      %29 = vector.load %arg6[%c0_13, %c0_14] : memref<8x128xf32, #tpu.memory_space<vmem>>, vector<8x128xf32>
      %30 = vector.shape_cast %17 : vector<8x128xf32> to vector<1x8x128xf32>
      %cst_15 = arith.constant dense<0.000000e+00> : vector<8x128xf32>
      %31 = vector.multi_reduction <add>, %30, %cst_15 [0] : vector<1x8x128xf32> to vector<8x128xf32>
      %32 = arith.addf %29, %31 : vector<8x128xf32>
      %c0_16 = arith.constant 0 : index
      %c0_17 = arith.constant 0 : index
      %33 = vector.load %arg6[%c0_16, %c0_17] : memref<8x128xf32, #tpu.memory_space<vmem>>, vector<8x128xf32>
      tpu.vector_store %arg6[%c0_16, %c0_17], %32 {strides = array<i32>} : memref<8x128xf32, #tpu.memory_space<vmem>>, vector<8x128xf32>,
    } else {
    }
    %c1024_i32_9 = arith.constant 1024 : i32
    %22 = arith.addi %5, %c1024_i32_9 : i32
    %23 = arith.cmpi sgt, %22, %6 : i32
    %24 = arith.extui %23 : i1 to i32
    %c0_i32_10 = arith.constant 0 : i32
    %25 = arith.cmpi ne, %24, %c0_i32_10 : i32
    scf.if %25 {
      %29 = tpu.iota {dimensions = array<i32: 0>} : vector<8x128xi32>
      %30 = tpu.iota {dimensions = array<i32: 1>} : vector<8x128xi32>
      %c128_i32 = arith.constant 128 : i32
      %31 = vector.broadcast %c128_i32 : i32 to vector<8x128xi32>
      %32 = arith.muli %29, %31 : vector<8x128xi32>
      %33 = arith.addi %32, %30 : vector<8x128xi32>
      %34 = arith.subi %6, %5 : i32
      %35 = vector.broadcast %34 : i32 to vector<8x128xi32>
      %36 = arith.cmpi slt, %33, %35 : vector<8x128xi32>
      %cst_13 = arith.constant 0.000000e+00 : f32
      %37 = vector.broadcast %cst_13 : f32 to vector<8x128xf32>
      %38 = arith.select %36, %17, %37 : vector<8x128xi1>, vector<8x128xf32>
      %c0_14 = arith.constant 0 : index
      %c0_15 = arith.constant 0 : index
      %39 = vector.load %arg6[%c0_14, %c0_15] : memref<8x128xf32, #tpu.memory_space<vmem>>, vector<8x128xf32>
      %40 = vector.shape_cast %38 : vector<8x128xf32> to vector<1x8x128xf32>
      %cst_16 = arith.constant dense<0.000000e+00> : vector<8x128xf32>
      %41 = vector.multi_reduction <add>, %40, %cst_16 [0] : vector<1x8x128xf32> to vector<8x128xf32>
      %42 = arith.addf %39, %41 : vector<8x128xf32>
      %c0_17 = arith.constant 0 : index
      %c0_18 = arith.constant 0 : index
      %43 = vector.load %arg6[%c0_17, %c0_18] : memref<8x128xf32, #tpu.memory_space<vmem>>, vector<8x128xf32>
      tpu.vector_store %arg6[%c0_17, %c0_18], %42 {strides = array<i32>} : memref<8x128xf32, #tpu.memory_space<vmem>>, vector<8x128xf32>,
    } else {
    }
    %c0_i32_11 = arith.constant 0 : i32
    %26 = arith.cmpi eq, %arg1, %c0_i32_11 : i32
    %27 = arith.extui %26 : i1 to i32
    %c0_i32_12 = arith.constant 0 : i32
    %28 = arith.cmpi ne, %27, %c0_i32_12 : i32
    scf.if %28 {
      %c0_13 = arith.constant 0 : index
      %c0_14 = arith.constant 0 : index
      %29 = vector.load %arg6[%c0_13, %c0_14] : memref<8x128xf32, #tpu.memory_space<vmem>>, vector<8x128xf32>
      %30 = vector.shape_cast %29 : vector<8x128xf32> to vector<1x8x128xf32>
      %c0_15 = arith.constant 0 : index
      %c0_16 = arith.constant 0 : index
      %c0_17 = arith.constant 0 : index
      %31 = vector.load %arg5[%c0_15, %c0_16, %c0_17] : memref<1x8x128xf32, #tpu.memory_space<vmem>>, vector<1x8x128xf32>
      tpu.vector_store %arg5[%c0_15, %c0_16, %c0_17], %30 {strides = array<i32>} : memref<1x8x128xf32, #tpu.memory_space<vmem>>, vector<1x8x128xf32>,
    } else {
    }
    return
  }
  func.func @transform_0(%arg0: i32, %arg1: i32, %arg2: memref<1xi32, #tpu.memory_space<smem>>) -> (i32, i32) {
    %c1_i32 = arith.constant 1 : i32
    %0 = arith.muli %arg0, %c1_i32 : i32
    %1 = arith.addi %0, %arg1 : i32
    %c0_i32 = arith.constant 0 : i32
    %2 = arith.minsi %1, %c0_i32 : i32
    %c0_i32_0 = arith.constant 0 : i32
    %c0_i32_1 = arith.constant 0 : i32
    return %2, %c0_i32_0 : i32, i32
  }
  func.func @transform_1(%arg0: i32, %arg1: i32, %arg2: memref<1xi32, #tpu.memory_space<smem>>) -> (i32, i32) {
    %c1_i32 = arith.constant 1 : i32
    %0 = arith.muli %arg0, %c1_i32 : i32
    %1 = arith.addi %0, %arg1 : i32
    %c0_i32 = arith.constant 0 : i32
    %2 = arith.minsi %1, %c0_i32 : i32
    %c0_i32_0 = arith.constant 0 : i32
    %c0_i32_1 = arith.constant 0 : i32
    return %2, %c0_i32_0 : i32, i32
  }
  func.func @transform_2(%arg0: i32, %arg1: i32, %arg2: memref<1xi32, #tpu.memory_space<smem>>) -> (i32, i32, i32) {
    %c0_i32 = arith.constant 0 : i32
    %c0_i32_0 = arith.constant 0 : i32
    %c0_i32_1 = arith.constant 0 : i32
    return %arg0, %c0_i32, %c0_i32_0 : i32, i32, i32
  }
}

</mosaic_0001>

<bundles_post_ra>
// kernel: tpu_custom_call.1
= control target key start
LH: loop header
LB: loop body
LE: loop exit
PB: predicated region body
PF: predicated region fallthrough
CT: control target
= control target key end

     0   :  { %9 = vsyncpa [#allocation6], 0  ;;  %v204_v1 = vmov 0.0   ;;  %s253_s0 = inlined_call_operand.<no memory space> [shape: s32[1], index: 0, kind: input, shape index: {}]   ;;  %s254_s1 = inlined_call_operand.vmem [shape: f32[2,128], index: 1, kind: input, shape index: {}]   ;;  %s255_s2 = inlined_call_operand.vmem [shape: f32[2,128], index: 2, kind: input, shape index: {}]   ;;  %s256_s3 = inlined_call_operand.hbm [shape: f32[1,8,128], index: 3, kind: output, shape index: {}]  }
   0x1   :  { %v106_v0 = vld [vmem:[%s254_s1] sm:$0xff]  ;;  %102 = vst [vmem:[#allocation2] sm:$0xff] %v204_v1  ;;  %p173_p0 = scmp.lt.s32.totalorder %s253_s0, 1024 }
   0x2   :  { %v107_v2 = vmul.f32 0.5, %v106_v0  ;;  %v111_v5 = vld [vmem:[%s255_s2] sm:$0xff] }
   0x4   :  { %178 = vtanh.f32 %v107_v2 }
   0x8   :  { %v119_v9 = vld [vmem:[#allocation2] sm:$0xff] (!%p173_p0) }
   0xe   :  { %v179_v3 = vpop.eup %178 }
   0xf   :  { %v109_v4 = vadd.f32 1.0, %v179_v3  ;;  %118 = sbr.rel (%p173_p0) target bundleno = 26 (0x1a), region = 17 }
  0x11   :  { %v110_v6 = vmul.f32 0.5, %v109_v4 }
  0x13   :  { %v112_v7 = vsub.f32 %v110_v6, %v111_v5 }
  0x15   :  { %v113_v8 = vmul.f32 %v112_v7, %v112_v7 }
  0x17   :  { %v121_v10 = vadd.f32 %v119_v9, %v113_v8 }
  0x19   :  { %122 = vst [vmem:[#allocation2] sm:$0xff] %v121_v10 }
  0x1a PF:  { %p175_p1 = scmp.ge.s32.totalorder %s253_s0, 1024 }
  0x1b   :  { %v127_v11 = vlaneseq (!%p175_p1)  ;;  %v134_v15 = vstv (!%p175_p1), %s253_s0 }
  0x1c   :  { %126 = sbr.rel (%p175_p1) target bundleno = 40 (0x28), region = 21 }
  0x1d   :  { %v128_v12 = vshrl.u32 (!%p175_p1), %v127_v11, 7  ;;  %v130_v13 = vand.u32 (!%p175_p1), 127, %v127_v11 }
  0x1f   :  { %v131_v14 = vmul.u32 (!%p175_p1), 128, %v128_v12 }
  0x20   :  { %v137_v17 = vld [vmem:[#allocation2] sm:$0xff] (!%p175_p1) }
  0x21   :  { %v132_v16 = vadd.s32 (!%p175_p1), %v131_v14, %v130_v13 }
  0x23   :  { %vm135_vm0 = vcmp.lt.s32.totalorder %v132_v16, %v134_v15 }
  0x24   :  { %v136_v18 = vsel %vm135_vm0, %v113_v8, 0.0 }
  0x25   :  { %v139_v19 = vadd.f32 %v137_v17, %v136_v18 }
  0x27   :  { %140 = vst [vmem:[#allocation2] sm:$0xff] %v139_v19 }
  0x28 PF:  { %s205_s20 = smov [#allocation5]  }
  0x29   :  { %s152_s21 = sshll.u32 %s205_s20, 4  ;;  %s153_s21 = int_to_ptr.vmem [resolvable:$true] %s152_s21 }
  0x2a   :  { %s180_s22 = scalar_lea.vmem %s153_s21, 128  ;;  %p185_p3 = scmp.lt.s32.totalorder %s153_s21, %s153_s21 }
  0x2b   :  { %p181_p2 = scmp.ne.s32.totalorder %s153_s21, %s180_s22  ;;  %p186_p4 = scmp.lt.s32.totalorder %s180_s22, %s180_s22 }
  0x2d   :  { %p187_p5 = por %p186_p4, %p185_p3 }
  0x2e   :  { %v144_v20 = vld [vmem:[#allocation2] sm:$0xff] }
  0x2f   :  { %145 = vst [vmem:[#allocation5] sm:$0xff] %v144_v20  ;;  %p188_p6 = pnand %p187_p5, %p181_p2 }
  0x31   :  { %191 = shalt.err (!%p188_p6)
}
  0x32   :  { %s192_s24 = scalar_lea.hbm %s256_s3, 128 }
  0x33   :  { %p193_p7 = scmp.ne.s32.totalorder %s256_s3, %s192_s24  ;;  %p196_p8 = scmp.lt.u32.totalorder %s192_s24, %s256_s3 }
  0x35   :  { %p198_p9 = pnand %p196_p8, %p193_p7 }
  0x37   :  { %201 = shalt.err (!%p198_p9)
}
  0x38   :  { %155 = dma.vmem_to_hbm [thread:$0]  %s153_s21, 128, %s256_s3, [#allocation6]  }
  0x39   :  { %202 = dma.done.wait [#allocation6], 128  }
  0x3a   :  { %203 = vsyncadd [#allocation6], 4294967168 }
  0x3b   :  { %159 = vsyncpa [#allocation6], 1 }

</bundles_post_ra>
